<compile_context>
chip_gen: v7x
topology: tpu7x:2x2x1
jax: 0.10.0
libtpu: 0.0.40
codegen_flags: <defaults>
</compile_context>

<pallas_src>
import functools

import jax
import jax.numpy as jnp
from jax.experimental import pallas as pl
from jax.experimental.pallas import tpu as pltpu

_LANES = 128


def _ce_kernel(pred_ref, gt_ref, out_ref, *, num_valid, tile_rows):
    i = pl.program_id(1)

    @pl.when(i == 0)
    def _():
        out_ref[...] = jnp.zeros_like(out_ref)

    # (C, TR, 128) float32; keep the f32 cast (v5e has no bf16 VPU/EUP).
    x = pred_ref[...].astype(jnp.float32)
    s = jax.nn.sigmoid(x)

    # sigmoid outputs are in (0,1) => exp(s) in (1,e): no overflow possible,
    # so the usual max-subtraction is skipped.
    lse = jnp.log(jnp.sum(jnp.exp(s), axis=0))          # (TR, 128)

    gt = gt_ref[...]                                    # (TR, 128) int32
    class_ids = jax.lax.broadcasted_iota(jnp.int32, x.shape, 0)   # (C, TR, 128)
    onehot = (class_ids == gt[None]).astype(jnp.float32)
    picked = jnp.sum(s * onehot, axis=0)                # (TR, 128)

    # Mask padded / out-of-range pixels so they contribute 0 to the sum.
    row = jax.lax.broadcasted_iota(jnp.int32, lse.shape, 0)
    lane = jax.lax.broadcasted_iota(jnp.int32, lse.shape, 1)
    pix = i * (tile_rows * _LANES) + row * _LANES + lane
    loss = jnp.where(pix < num_valid, lse - picked, 0.0)

    # Lane-dense VPU accumulation into the resident output block.
    out_ref[...] += loss


def cross_entropy_loss(pred, gt, *, block_rows=32):
    """pred: (N, C, H, W) float; gt: (N, H, W) int. Returns scalar f32 loss."""
    N, C, H, W = pred.shape
    M = H * W                                   # real pixels per image
    assert block_rows % 8 == 0

    pred_flat = pred.reshape(N, C, M)           # free, contiguous reshape
    gt_flat = gt.astype(jnp.int32).reshape(N, M)

    # Pad pixel axis up to a multiple of 128 so it can sit on the lane axis.
    m_pad = ((M + _LANES - 1) // _LANES) * _LANES
    if m_pad != M:
        # TODO(synk): this pad is one extra copy; only hit when H*W % 128 != 0.
        pred_flat = jnp.pad(pred_flat, ((0, 0), (0, 0), (0, m_pad - M)))
        gt_flat = jnp.pad(gt_flat, ((0, 0), (0, m_pad - M)))
    R = m_pad // _LANES

    pred4 = pred_flat.reshape(N, C, R, _LANES)  # free reshape
    gt3 = gt_flat.reshape(N, R, _LANES)

    tile_rows = min(block_rows, R)
    grid = (N, pl.cdiv(R, tile_rows))

    kernel = functools.partial(_ce_kernel, num_valid=M, tile_rows=tile_rows)

    partials = pl.pallas_call(
        kernel,
        out_shape=jax.ShapeDtypeStruct((N, tile_rows, _LANES), jnp.float32),
        grid_spec=pltpu.PrefetchScalarGridSpec(
            num_scalar_prefetch=0,
            grid=grid,
            in_specs=[
                pl.BlockSpec((pl.Squeezed(), C, tile_rows, _LANES),
                             lambda n, i: (n, 0, i, 0)),
                pl.BlockSpec((pl.Squeezed(), tile_rows, _LANES),
                             lambda n, i: (n, i, 0)),
            ],
            out_specs=pl.BlockSpec((pl.Squeezed(), tile_rows, _LANES),
                                   lambda n, i: (n, 0, 0)),
        ),
        compiler_params=pltpu.CompilerParams(
            dimension_semantics=("parallel", "arbitrary"),
        ),
    )(pred4, gt3)

    # Tiny final reduction + mean over the *real* pixel count.
    return jnp.sum(partials) / jnp.float32(N * M)


def _reference(pred, gt):
    # pure-JAX reference of sigmoid -> cross_entropy(mean over pixels)
    s = jax.nn.sigmoid(pred.astype(jnp.float32))             # (N, C, H, W)
    logp = jax.nn.log_softmax(s, axis=1)
    onehot = jax.nn.one_hot(gt, pred.shape[1], axis=1)       # (N, C, H, W)
    nll = -jnp.sum(logp * onehot, axis=1)                    # (N, H, W)
    return jnp.mean(nll)


if __name__ == "__main__":
    key = jax.random.PRNGKey(0)
    k1, k2 = jax.random.split(key)

    N, C, H, W = 2, 4, 16, 16
    pred = jax.random.normal(k1, (N, C, H, W), dtype=jnp.float32)
    gt = jax.random.randint(k2, (N, H, W), 0, C, dtype=jnp.int32)

    loss = cross_entropy_loss(pred, gt)
    loss = jax.block_until_ready(loss)

    ref = _reference(pred, gt)
    assert jnp.allclose(loss, ref, rtol=1e-5, atol=1e-5), (loss, ref)

    print("KERNEL_OK")
</pallas_src>

<mosaic_0001>
module attributes {stable_mosaic.version = 11 : i64} {
  func.func @_ce_kernel(%arg0: i32, %arg1: i32, %arg2: memref<1x4x2x128xf32, #tpu.memory_space<vmem>>, %arg3: memref<1x2x128xi32, #tpu.memory_space<vmem>>, %arg4: memref<1x2x128xf32, #tpu.memory_space<vmem>>) attributes {dimension_semantics = [#tpu.dimension_semantics<parallel>, #tpu.dimension_semantics<arbitrary>], iteration_bounds = array<i64: 2, 1>, scalar_prefetch = 0 : i64, scratch_operands = 0 : i64, tpu.core_type = #tpu.core_type<tc>, window_params = [{transform_indices = @transform_0, window_bounds = array<i64: 1, 4, 2, 128>}, {transform_indices = @transform_1, window_bounds = array<i64: 1, 2, 128>}, {transform_indices = @transform_2, window_bounds = array<i64: 1, 2, 128>}]} {
    %c0_i32 = arith.constant 0 : i32
    %0 = arith.cmpi eq, %arg1, %c0_i32 : i32
    %1 = arith.extui %0 : i1 to i32
    %c0_i32_0 = arith.constant 0 : i32
    %2 = arith.cmpi ne, %1, %c0_i32_0 : i32
    scf.if %2 {
      %cst_17 = arith.constant 0.000000e+00 : f32
      %42 = vector.broadcast %cst_17 : f32 to vector<2x128xf32>
      %c0_18 = arith.constant 0 : index
      %c0_19 = arith.constant 0 : index
      %c0_20 = arith.constant 0 : index
      %43 = vector.load %arg4[%c0_18, %c0_19, %c0_20] : memref<1x2x128xf32, #tpu.memory_space<vmem>>, vector<1x2x128xf32>
      %44 = vector.shape_cast %43 : vector<1x2x128xf32> to vector<2x128xf32>
      %45 = vector.shape_cast %42 : vector<2x128xf32> to vector<1x2x128xf32>
      tpu.vector_store %arg4[%c0_18, %c0_19, %c0_20], %45 {strides = array<i32>} : memref<1x2x128xf32, #tpu.memory_space<vmem>>, vector<1x2x128xf32>,
    } else {
    }
    %c0 = arith.constant 0 : index
    %c0_1 = arith.constant 0 : index
    %c0_2 = arith.constant 0 : index
    %c0_3 = arith.constant 0 : index
    %3 = vector.load %arg2[%c0, %c0_1, %c0_2, %c0_3] : memref<1x4x2x128xf32, #tpu.memory_space<vmem>>, vector<1x4x2x128xf32>
    %4 = vector.shape_cast %3 : vector<1x4x2x128xf32> to vector<4x2x128xf32>
    %5 = arith.negf %4 : vector<4x2x128xf32>
    %6 = math.exp %5 : vector<4x2x128xf32>
    %cst = arith.constant 1.000000e+00 : f32
    %7 = vector.broadcast %cst : f32 to vector<4x2x128xf32>
    %8 = arith.addf %7, %6 : vector<4x2x128xf32>
    %9 = arith.divf %7, %8 : vector<4x2x128xf32>
    %10 = math.exp %9 : vector<4x2x128xf32>
    %cst_4 = arith.constant dense<0.000000e+00> : vector<2x128xf32>
    %11 = vector.multi_reduction <add>, %10, %cst_4 [0] : vector<4x2x128xf32> to vector<2x128xf32>
    %12 = math.log %11 : vector<2x128xf32>
    %c0_5 = arith.constant 0 : index
    %c0_6 = arith.constant 0 : index
    %c0_7 = arith.constant 0 : index
    %13 = vector.load %arg3[%c0_5, %c0_6, %c0_7] : memref<1x2x128xi32, #tpu.memory_space<vmem>>, vector<1x2x128xi32>
    %14 = vector.shape_cast %13 : vector<1x2x128xi32> to vector<2x128xi32>
    %15 = tpu.iota {dimensions = array<i32: 0>} : vector<4x2x128xi32>
    %16 = vector.shape_cast %14 : vector<2x128xi32> to vector<1x2x128xi32>
    %17 = vector.broadcast %16 : vector<1x2x128xi32> to vector<4x2x128xi32>
    %18 = arith.cmpi eq, %15, %17 : vector<4x2x128xi32>
    %19 = arith.extui %18 : vector<4x2x128xi1> to vector<4x2x128xi32>
    %20 = arith.sitofp %19 : vector<4x2x128xi32> to vector<4x2x128xf32>
    %21 = arith.mulf %9, %20 : vector<4x2x128xf32>
    %cst_8 = arith.constant dense<0.000000e+00> : vector<2x128xf32>
    %22 = vector.multi_reduction <add>, %21, %cst_8 [0] : vector<4x2x128xf32> to vector<2x128xf32>
    %23 = tpu.iota {dimensions = array<i32: 0>} : vector<2x128xi32>
    %24 = tpu.iota {dimensions = array<i32: 1>} : vector<2x128xi32>
    %c256_i32 = arith.constant 256 : i32
    %25 = arith.muli %arg1, %c256_i32 : i32
    %c128_i32 = arith.constant 128 : i32
    %26 = vector.broadcast %c128_i32 : i32 to vector<2x128xi32>
    %27 = arith.muli %23, %26 : vector<2x128xi32>
    %28 = vector.broadcast %25 : i32 to vector<2x128xi32>
    %29 = arith.addi %28, %27 : vector<2x128xi32>
    %30 = arith.addi %29, %24 : vector<2x128xi32>
    %c256_i32_9 = arith.constant 256 : i32
    %31 = vector.broadcast %c256_i32_9 : i32 to vector<2x128xi32>
    %32 = arith.cmpi slt, %30, %31 : vector<2x128xi32>
    %33 = arith.subf %12, %22 : vector<2x128xf32>
    %cst_10 = arith.constant 0.000000e+00 : f32
    %34 = vector.broadcast %cst_10 : f32 to vector<2x128xf32>
    %35 = arith.select %32, %33, %34 : vector<2x128xi1>, vector<2x128xf32>
    %c0_11 = arith.constant 0 : index
    %c0_12 = arith.constant 0 : index
    %c0_13 = arith.constant 0 : index
    %36 = vector.load %arg4[%c0_11, %c0_12, %c0_13] : memref<1x2x128xf32, #tpu.memory_space<vmem>>, vector<1x2x128xf32>
    %37 = vector.shape_cast %36 : vector<1x2x128xf32> to vector<2x128xf32>
    %38 = arith.addf %37, %35 : vector<2x128xf32>
    %c0_14 = arith.constant 0 : index
    %c0_15 = arith.constant 0 : index
    %c0_16 = arith.constant 0 : index
    %39 = vector.load %arg4[%c0_14, %c0_15, %c0_16] : memref<1x2x128xf32, #tpu.memory_space<vmem>>, vector<1x2x128xf32>
    %40 = vector.shape_cast %39 : vector<1x2x128xf32> to vector<2x128xf32>
    %41 = vector.shape_cast %38 : vector<2x128xf32> to vector<1x2x128xf32>
    tpu.vector_store %arg4[%c0_14, %c0_15, %c0_16], %41 {strides = array<i32>} : memref<1x2x128xf32, #tpu.memory_space<vmem>>, vector<1x2x128xf32>,
    return
  }
  func.func @transform_0(%arg0: i32, %arg1: i32) -> (i32, i32, i32, i32) {
    %c0_i32 = arith.constant 0 : i32
    %c0_i32_0 = arith.constant 0 : i32
    %c0_i32_1 = arith.constant 0 : i32
    return %arg0, %c0_i32, %arg1, %c0_i32_0 : i32, i32, i32, i32
  }
  func.func @transform_1(%arg0: i32, %arg1: i32) -> (i32, i32, i32) {
    %c0_i32 = arith.constant 0 : i32
    %c0_i32_0 = arith.constant 0 : i32
    return %arg0, %arg1, %c0_i32 : i32, i32, i32
  }
  func.func @transform_2(%arg0: i32, %arg1: i32) -> (i32, i32, i32) {
    %c0_i32 = arith.constant 0 : i32
    %c0_i32_0 = arith.constant 0 : i32
    %c0_i32_1 = arith.constant 0 : i32
    return %arg0, %c0_i32, %c0_i32_0 : i32, i32, i32
  }
}

</mosaic_0001>

<bundles_post_ra>
// kernel: tpu_custom_call.1
= control target key start
LH: loop header
LB: loop body
LE: loop exit
PB: predicated region body
PF: predicated region fallthrough
CT: control target
= control target key end

     0   :  { %7 = vsyncpa [#allocation3], 0  ;;  %s953_s0 = inlined_call_operand.hbm [shape: f32[2,4,2,128], index: 0, kind: input, shape index: {}]   ;;  %s954_s1 = inlined_call_operand.hbm [shape: s32[2,2,128], index: 1, kind: input, shape index: {}]   ;;  %s955_s2 = inlined_call_operand.hbm [shape: f32[2,2,128], index: 2, kind: output, shape index: {}]  }
   0x1   :  { %9 = vsyncpa [#allocation3 + $0x1], 0 }
   0x2   :  { %10 = vsyncpa [#allocation6], 0 }
   0x3   :  { %12 = vsyncpa [#allocation6 + $0x1], 0 }
   0x4   :  { %13 = vsyncpa [#allocation4], 0 }
   0x5   :  { %15 = vsyncpa [#allocation4 + $0x1], 0  ;;  %s716_s9 = smov 0   ;;  %s718_s10 = smov 0  }
   0x6   :  { %s720_s11 = smov 0   ;;  %s722_s12 = smov 0  }
   0x7   :  { %s724_s13 = smov 0   ;;  %s726_s14 = smov 0  }
   0x8 LB: > { %s425_s15 = sadd.s32 4294967295, %s693_s14   ;;  %s426_s16 = sadd.s32 4294967294, %s693_s14   ;;  %s693_s14 = sphi %s726_s14, %s21_s14   ;;  %s689_s13 = sphi %s724_s13, %s974_s13   ;;  %s685_s12 = sphi %s722_s12, %s973_s12   ;;  %s681_s11 = sphi %s720_s11, %s972_s11   ;;  %s677_s10 = sphi %s718_s10, %s971_s10   ;;  %s673_s9 = sphi %s716_s9, %s970_s9  }
   0x9   : > { %s33_s17 = sadd.s32 1, %s689_s13  ;;  %s42_s18 = sadd.s32 1, %s681_s11 }
   0xa   : > { %p35_p0 = scmp.ge.s32.totalorder %s33_s17, 2  ;;  %p49_p1 = scmp.ne.s32.totalorder %s681_s11, %s677_s10 }
   0xb   : > { %p50_p2 = scmp.eq.s32.totalorder %s693_s14, 0  ;;  %p55_p3 = scmp.ne.s32.totalorder %s677_s10, %s673_s9 }
   0xc   : > { %s976_s17 = smov (%p35_p0, %s33_s17), 0  ;;  %p56_p5 = scmp.eq.s32.totalorder %s425_s15, 0 }
   0xd   : > { %p757_p4 = por %p50_p2, %p49_p1  ;;  %s37_s20 = ssub.s32 %s689_s13, %s976_s17 }
   0xe   : > { %p107_p6 = scmp.eq.s32.totalorder %s425_s15, 1  ;;  %p40_p7 = scmp.eq.s32.totalorder %s37_s20, 0 }
   0xf   : > { %p763_p8 = por %p56_p5, %p55_p3  ;;  %p113_p10 = scmp.eq.s32.totalorder %s426_s16, 1 }
  0x10   : > { %p767_p9 = por %p107_p6, %p49_p1  ;;  %p468_p13 = scmp.lt.s32.totalorder %s693_s14, 2 }
  0x11   : > { %s959_s21 = scalar_select %p763_p8, 1, 0 }
  0x12   : > { %s960_s22 = scalar_select %p767_p9, 1, 0 }
  0x13   : > { %s772_s23 = scalar_select %p40_p7, %s681_s11, %s42_s18  }
  0x14   : > { %p774_p11 = por %p113_p10, %p55_p3  ;;  %s781_s25 = sand.u32 1, %s681_s11  }
  0x15   : > { %s429_s26 = sshll.u32 %s781_s25, 3  ;;  %s450_s27 = sshll.u32 %s689_s13, 7 }
  0x16   : > { %s961_s24 = scalar_select %p774_p11, 1, 0 }
  0x17   : > { %s788_s30 = scalar_lea.hbm %s953_s0, %s450_s27  ;;  %s137_s3 = scalar_lea.vmem [#allocation2], %s429_s26 }
  0x18   : > { %s145_s4 = sshll.u32 %s137_s3, 4  ;;  %p794_p0 = pnand %p468_p13, %p757_p4  ;;  %s790_s4 = int_to_ptr.vmem [resolvable:$true] %s145_s4 }
  0x19   : > { %s134_s6 = scalar_lea.sflag [#allocation3], %s781_s25  ;;  %s547_s7 = scalar_lea.hbm %s788_s30, 128 }
  0x1a   : > { %p548_p2 = scmp.ne.s32.totalorder %s788_s30, %s547_s7  ;;  %p549_p3 = pneg %p794_p0 }
  0x1b   : > { %s552_s16 = scalar_lea.hbm %s953_s0, 256  ;;  %p553_p4 = scmp.lt.u32.totalorder %s788_s30, %s953_s0 }
  0x1c   : > { %p550_p5 = pnand %p549_p3, %p548_p2  ;;  %p554_p7 = scmp.lt.u32.totalorder %s552_s16, %s547_s7 }
  0x1d   : > { %p556_p13 = scmp.lt.u32.totalorder %s547_s7, %s788_s30 }
  0x1e   : > { %p551_p6 = pneg %p550_p5  ;;  %p555_p10 = por %p554_p7, %p553_p4 }
  0x20   : > { %p557_p12 = por %p556_p13, %p555_p10 }
  0x22   : > { %p558_p1 = pnand %p557_p12, %p551_p6 }
  0x24   : > { %561 = shalt.err (!%p558_p1)
}
  0x25   : > { %s562_s20 = scalar_lea.vmem %s790_s4, 128  ;;  %s695_s26 = smov [#allocation2]  }
  0x26   : > { %p563_p2 = scmp.ne.s32.totalorder %s790_s4, %s562_s20  ;;  %s567_s27 = sshll.u32 %s695_s26, 4  ;;  %s568_s27 = int_to_ptr.vmem [resolvable:$false] %s567_s27 }
  0x27   : > { %s569_s28 = scalar_lea.vmem %s568_s27, 256  ;;  %p570_p9 = scmp.lt.s32.totalorder %s790_s4, %s568_s27 }
  0x28   : > { %p565_p5 = pnand %p563_p2, %p549_p3  ;;  %p571_p4 = scmp.lt.s32.totalorder %s569_s28, %s562_s20 }
  0x2a   : > { %p566_p11 = pneg %p565_p5  ;;  %p572_p7 = por %p571_p4, %p570_p9 }
  0x2c   : > { %p573_p10 = pnand %p572_p7, %p566_p11 }
  0x2e   : > { %576 = shalt.err (!%p573_p10)
}
  0x2f   : > { %s696_s29 = smov 32   ;;  %s697_s3 = smov 2  }
  0x30   : > { %460 = dma.hbm_to_vmem [thread:$0]  (!%p794_p0), %s788_s30, 128, %s790_s4, %s134_s6, %s696_s29, %s696_s29, %s697_s3  }
  0x31   : > { %p172_p12 = scmp.lt.s32.totalorder %s693_s14, 3  ;;  %s432_s7 = sshll.u32 %s781_s25, 1 }
  0x32   : > { %s433_s8 = sshll.u32 %s689_s13, 5  ;;  %p963_p9 = scmp.ge.s32.totalorder %s693_s14, 1 }
  0x33   : > { %s839_s19 = scalar_lea.hbm %s954_s1, %s433_s8  ;;  %s159_s20 = scalar_lea.vmem [#allocation5], %s432_s7 }
  0x34   : > { %p832_p11 = pnand %p963_p9, %p172_p12  ;;  %s167_s26 = sshll.u32 %s159_s20, 4  ;;  %s168_s26 = int_to_ptr.vmem [resolvable:$true] %s167_s26 }
  0x35   : > { %s156_s30 = scalar_lea.sflag [#allocation6], %s781_s25  ;;  %s577_s4 = scalar_lea.hbm %s839_s19, 32 }
  0x36   : > { %s964_s15 = scalar_select %p832_p11, 1, 0 }
  0x37   : > { %p578_p1 = scmp.ne.s32.totalorder %s839_s19, %s577_s4  ;;  %s582_s28 = scalar_lea.hbm %s954_s1, 64 }
  0x38   : > { %p583_p2 = scmp.lt.u32.totalorder %s839_s19, %s954_s1  ;;  %p584_p5 = scmp.lt.u32.totalorder %s582_s28, %s577_s4 }
  0x39   : > { %p580_p6 = pnand %p578_p1, %p549_p3  ;;  %p586_p7 = scmp.lt.u32.totalorder %s577_s4, %s839_s19 }
  0x3a   : > { %p585_p4 = por %p584_p5, %p583_p2 }
  0x3b   : > { %p581_p13 = pneg %p580_p6 }
  0x3c   : > { %p587_p10 = por %p586_p7, %p585_p4 }
  0x3e   : > { %p588_p12 = pnand %p587_p10, %p581_p13 }
  0x40   : > { %591 = shalt.err (!%p588_p12)
}
  0x41   : > { %s592_s25 = scalar_lea.vmem %s168_s26, 32  ;;  %s698_s7 = smov [#allocation5]  }
  0x42   : > { %p593_p9 = scmp.ne.s32.totalorder %s168_s26, %s592_s25  ;;  %s597_s8 = sshll.u32 %s698_s7, 4  ;;  %s598_s8 = int_to_ptr.vmem [resolvable:$false] %s597_s8 }
  0x43   : > { %s599_s16 = scalar_lea.vmem %s598_s8, 64  ;;  %p600_p8 = scmp.lt.s32.totalorder %s168_s26, %s598_s8 }
  0x44   : > { %p595_p1 = pnand %p593_p9, %p549_p3  ;;  %p601_p11 = scmp.lt.s32.totalorder %s599_s16, %s592_s25 }
  0x46   : > { %p596_p6 = pneg %p595_p1  ;;  %p602_p2 = por %p601_p11, %p600_p8 }
  0x48   : > { %p603_p5 = pnand %p602_p2, %p596_p6 }
  0x4a   : > { %606 = shalt.err (!%p603_p5)
}
  0x4b   : > { %463 = dma.hbm_to_vmem [thread:$0]  (!%p794_p0), %s839_s19, 32, %s168_s26, %s156_s30  }
  0x4c   : > { %p965_p13 = scmp.ne.s32.totalorder %s964_s15, 0 }
  0x4d   : > { %s864_s18 = sand.u32 (!%p965_p13), 1, %s677_s10   ;;  %p966_p3 = scmp.ne.s32.totalorder (!%p965_p13), %s959_s21, 0 }
  0x4e   : > { %176 = sbr.rel (%p965_p13) target bundleno = 170 (0xaa), region = 28  ;;  %s435_s20 = sshll.u32 (!%p965_p13), %s864_s18, 3 }
  0x4f   : > { %s179_s4 = scalar_lea.sflag (!%p965_p13), [#allocation3], %s864_s18  ;;  %s182_s6 = scalar_lea.vmem (!%p965_p13), [#allocation2], %s435_s20 }
  0x55   : > { %660 = dma.done.wait (%p966_p3), %s179_s4, 128  }
  0x56   : > { %662 = vsyncadd (%p966_p3), %s179_s4, 4294967168  ;;  %s436_s5 = sshll.u32 %s864_s18, 1  ;;  %s188_s15 = scalar_lea.sflag [#allocation6], %s864_s18 }
  0x57   : > { %s874_s19 = scalar_lea.vmem [#allocation5], %s436_s5 }
  0x58   : > { %664 = dma.done.wait (%p966_p3), %s188_s15, 32  }
  0x59   : > { %666 = vsyncadd (%p966_p3), %s188_s15, 4294967264  ;;  %s880_s26 = scalar_lea.vmem [#allocation7], %s436_s5  ;;  %v699_v0 = vmov 0.0   ;;  %v222_v1 = vld [vmem:[%s182_s6] sm:$0x3]  ;;  %vm258_vm2 = vcmask 1041408   ;;  %v292_v41 = vlaneseq }
  0x5a   : > { %221 = vst [vmem:[%s880_s26] sm:$0x3] %v699_v0  ;;  %v223_v2 = vld [vmem:[%s182_s6 + $0x2] sm:$0x3]  ;;  %v224_v3 = vld [vmem:[%s182_s6 + $0x4] sm:$0x3]  ;;  %s447_s21 = sshll.u32 %s685_s12, 5 }
  0x5b   : > { %v225_v4 = vld [vmem:[%s182_s6 + $0x6] sm:$0x3]  ;;  %v438_v5 = vmul.f32 -1.442695, %v222_v1  ;;  %v439_v6 = vmul.f32 -1.442695, %v223_v2  ;;  %s903_s29 = scalar_lea.hbm %s955_s2, %s447_s21 }
  0x5c   : > { %v440_v7 = vmul.f32 -1.442695, %v224_v3  ;;  %v441_v8 = vmul.f32 -1.442695, %v225_v4  ;;  %v268_v25 = vld [vmem:[%s874_s19] sm:$0x3] }
  0x5d   : > { %521 = vpow2.f32 %v438_v5  ;;  %vm269_vm0 = vcmp.eq.s32.totalorder %v268_v25, 0  ;;  %vm270_vm1 = vcmp.eq.s32.totalorder %v268_v25, 1  ;;  %vm271_vm3 = vcmp.eq.s32.totalorder %v268_v25, 2  ;;  %s321_s30 = sshll.u32 %s880_s26, 4  ;;  %s308_s3 = scalar_lea.sflag [#allocation4], %s864_s18  ;;  %s905_s30 = int_to_ptr.vmem [resolvable:$true] %s321_s30 }
  0x5e   : > { %523 = vpow2.f32 %v439_v6  ;;  %v442_v27 = vsel %vm269_vm0, 1.0, %v699_v0  ;;  %v443_v28 = vsel %vm270_vm1, 1.0, %v699_v0  ;;  %v444_v38 = vsel %vm271_vm3, 1.0, %v699_v0  ;;  %s607_s25 = scalar_lea.vmem %s905_s30, 32  ;;  %p967_p0 = scmp.ne.s32.totalorder %s960_s22, 0 }
  0x5f   : > { %525 = vpow2.f32 %v440_v7  ;;  %vm272_vm4 = vcmp.eq.s32.totalorder %v268_v25, 3  ;;  %v293_v47 = vshrl.u32 %v292_v41, 7  ;;  %v295_v51 = vand.u32 127, %v292_v41  ;;  %p608_p8 = scmp.ne.s32.totalorder %s905_s30, %s607_s25  ;;  %s700_s12 = smov [#allocation7]  }
  0x60   : > { %527 = vpow2.f32 %v441_v8  ;;  %v445_v46 = vsel %vm272_vm4, 1.0, %v699_v0  ;;  %s611_s7 = sshll.u32 %s700_s12, 4  ;;  %s612_s7 = int_to_ptr.vmem [resolvable:$false] %s611_s7 }
  0x61   : > { %v297_v52 = vmul.u32 128, %v293_v47  ;;  %v304_v60 = vld [vmem:[%s880_s26] sm:$0x3]  ;;  %p609_p11 = pnand %p608_p8, %p967_p0  ;;  %s613_s8 = scalar_lea.vmem %s612_s7, 64 }
  0x62   : > { %p614_p7 = scmp.lt.s32.totalorder %s905_s30, %s612_s7  ;;  %p615_p10 = scmp.lt.s32.totalorder %s613_s8, %s607_s25 }
  0x63   : > { %v300_v55 = vadd.s32 %v297_v52, %v295_v51  ;;  %p610_p4 = pneg %p609_p11 }
  0x64   : > { %p616_p12 = por %p615_p10, %p614_p7 }
  0x65   : > { %vm301_vm5 = vcmp.lt.s32.totalorder %v300_v55, 256 }
  0x66   : > { %p617_p9 = pnand %p616_p12, %p610_p4 }
  0x67   : > { %v522_v9 = vpop.eup %521 }
  0x68   : > { %v524_v10 = vpop.eup %523  ;;  %v238_v11 = vadd.f32 1.0, %v522_v9 }
  0x69   : > { %v526_v12 = vpop.eup %525  ;;  %v239_v13 = vadd.f32 1.0, %v524_v10 }
  0x6a   : > { %v528_v14 = vpop.eup %527  ;;  %v240_v15 = vadd.f32 1.0, %v526_v12  ;;  %529 = vrcp.f32 %v238_v11 }
  0x6b   : > { %v241_v16 = vadd.f32 1.0, %v528_v14  ;;  %531 = vrcp.f32 %v239_v13 }
  0x6c   : > { %533 = vrcp.f32 %v240_v15 }
  0x6d   : > { %535 = vrcp.f32 %v241_v16 }
  0x74   : > { %v530_v17 = vpop.eup %529 }
  0x75   : > { %v532_v18 = vpop.eup %531  ;;  %v250_v19 = vmul.f32 1.442695, %v530_v17  ;;  %v281_v34 = vmul.f32 %v530_v17, %v442_v27 }
  0x76   : > { %v534_v20 = vpop.eup %533  ;;  %v252_v21 = vmul.f32 1.442695, %v532_v18  ;;  %v282_v35 = vmul.f32 %v532_v18, %v443_v28 }
  0x77   : > { %v536_v22 = vpop.eup %535  ;;  %537 = vpow2.f32 %v250_v19  ;;  %v254_v23 = vmul.f32 1.442695, %v534_v20  ;;  %v283_v42 = vmul.f32 %v534_v20, %v444_v38  ;;  %v285_v43 = vsel %vm258_vm2, %v281_v34, 0.0 }
  0x78   : > { %539 = vpow2.f32 %v252_v21  ;;  %v256_v24 = vmul.f32 1.442695, %v536_v22  ;;  %v286_v44 = vsel %vm258_vm2, %v282_v35, 0.0  ;;  %v284_v49 = vmul.f32 %v536_v22, %v445_v46 }
  0x79   : > { %541 = vpow2.f32 %v254_v23  ;;  %v287_v48 = vadd.f32 %v286_v44, %v285_v43  ;;  %v288_v50 = vsel %vm258_vm2, %v283_v42, 0.0 }
  0x7a   : > { %543 = vpow2.f32 %v256_v24  ;;  %v290_v54 = vsel %vm258_vm2, %v284_v49, 0.0 }
  0x7b   : > { %v289_v53 = vadd.f32 %v288_v50, %v287_v48 }
  0x7d   : > { %v291_v56 = vadd.f32 %v290_v54, %v289_v53 }
  0x81   : > { %v538_v26 = vpop.eup %537 }
  0x82   : > { %v540_v29 = vpop.eup %539  ;;  %v259_v30 = vsel %vm258_vm2, %v538_v26, 0.0 }
  0x83   : > { %v542_v31 = vpop.eup %541  ;;  %v260_v32 = vsel %vm258_vm2, %v540_v29, 0.0 }
  0x84   : > { %v544_v33 = vpop.eup %543  ;;  %v261_v36 = vadd.f32 %v260_v32, %v259_v30  ;;  %v262_v37 = vsel %vm258_vm2, %v542_v31, 0.0 }
  0x85   : > { %v264_v39 = vsel %vm258_vm2, %v544_v33, 0.0 }
  0x86   : > { %v263_v40 = vadd.f32 %v262_v37, %v261_v36 }
  0x88   : > { %v265_v45 = vadd.f32 %v264_v39, %v263_v40 }
  0x8a   : > { %545 = vlog2.f32 %v265_v45 }
  0x94   : > { %v546_v57 = vpop.eup %545 }
  0x95   : > { %v267_v58 = vmul.f32 0.6931472, %v546_v57 }
  0x97   : > { %v302_v59 = vsub.f32 %v267_v58, %v291_v56 }
  0x99   : > { %v303_v61 = vsel %vm301_vm5, %v302_v59, 0.0 }
  0x9a   : > { %v305_v62 = vadd.f32 %v304_v60, %v303_v61 }
  0x9c   : > { %306 = vst [vmem:[%s880_s26] sm:$0x3] %v305_v62 }
  0x9d   : > { %620 = shalt.err (!%p617_p9)
}
  0x9e   : > { %s621_s16 = scalar_lea.hbm %s903_s29, 32  ;;  %s625_s4 = scalar_lea.hbm %s955_s2, 64 }
  0x9f   : > { %p622_p1 = scmp.ne.s32.totalorder %s903_s29, %s621_s16  ;;  %p626_p5 = scmp.lt.u32.totalorder %s903_s29, %s955_s2 }
  0xa0   : > { %p627_p13 = scmp.lt.u32.totalorder %s625_s4, %s621_s16  ;;  %p629_p8 = scmp.lt.u32.totalorder %s621_s16, %s903_s29 }
  0xa1   : > { %p623_p6 = pnand %p622_p1, %p967_p0 }
  0xa2   : > { %p628_p3 = por %p627_p13, %p626_p5 }
  0xa3   : > { %p624_p2 = pneg %p623_p6 }
  0xa4   : > { %p630_p11 = por %p629_p8, %p628_p3 }
  0xa6   : > { %p631_p4 = pnand %p630_p11, %p624_p2 }
  0xa8   : > { %634 = shalt.err (!%p631_p4)
}
  0xa9   : > { %455 = dma.vmem_to_hbm [thread:$0]  (%p967_p0), %s905_s30, 32, %s903_s29, %s308_s3  }
  0xaa PF: > { %s333_s15 = sand.u32 1, %s673_s9   ;;  %p968_p7 = scmp.ne.s32.totalorder %s961_s24, 0 }
  0xab   : > { %p969_p10 = scmp.ge.s32.totalorder %s693_s14, 2  ;;  %s334_s19 = scalar_lea.sflag [#allocation4], %s333_s15 }
  0xad   : > { %p465_p12 = pnand %p969_p10, %p968_p7 }
  0xaf   : > { %668 = dma.done.wait (!%p465_p12), %s334_s19, 32  }
  0xb0   : > { %670 = vsyncadd (!%p465_p12), %s334_s19, 4294967264  ;;  %s21_s14 = sadd.s32 1, %s693_s14   ;;  %s970_s9 = smov %s677_s10 }
  0xb1   : > { %p18_p9 = scmp.ge.s32.totalorder %s21_s14, 4   ;;  %s971_s10 = smov %s681_s11 }
  0xb2   : > { %s972_s11 = smov %s772_s23  ;;  %s973_s12 = smov %s689_s13 }
  0xb3   : > { %s974_s13 = smov %s976_s17  ;;  %20 = sbr.rel (!%p18_p9) target bundleno = 8 (0x8), region = 90 }
  0xba   :  { %339 = vsyncpa [#allocation3], 1 }
  0xbb   :  { %341 = vsyncpa [#allocation3 + $0x1], 1 }
  0xbc   :  { %342 = vsyncpa [#allocation6], 1 }
  0xbd   :  { %344 = vsyncpa [#allocation6 + $0x1], 1 }
  0xbe   :  { %345 = vsyncpa [#allocation4], 1 }
  0xbf   :  { %347 = vsyncpa [#allocation4 + $0x1], 1 }

</bundles_post_ra>
